<compile_context>
chip_gen: v6e
topology: v6e:2x2x1
jax: 0.10.0
libtpu: 0.0.40
codegen_flags: <defaults>
</compile_context>

<pallas_src>
import math

import jax
import jax.numpy as jnp
from jax.experimental import pallas as pl
from jax.experimental.pallas import tpu as pltpu


_MIB = 1024 * 1024
_VMEM_LIMIT_BYTES = 48 * _MIB    # > v5e's 16 MiB scoped default, < v7x's 64 MiB/TC
_TILE_BUDGET_BYTES = 36 * _MIB   # what the double-buffered tiles may consume
_RESIDENT_W_BYTES = 16 * _MIB    # max double-buffered weight footprint for residency


def _round_up(x, m):
    return ((x + m - 1) // m) * m


def _cdiv(a, b):
    return (a + b - 1) // b


def _tile_and_pad(dim, cap):
    """tile = min(cap, 128-padded dim); pad the dim up to a multiple of the tile.

    Review fix: never collapse to 128-tiles just because `cap` does not divide the
    padded dim — pad the dim to the tile instead (waste < one tile of zeros).
    """
    padded128 = _round_up(dim, 128)
    tile = min(cap, padded128)
    return tile, _round_up(dim, tile)


def _row_tile(P, K_pad, OC_pad, w_bytes):
    """Row-tile TM for the weight-resident path (and the padded row count)."""
    # double-buffered bf16 A row + double-buffered f32 out row, in bytes
    per_row = 2 * K_pad * 2 + 2 * OC_pad * 4
    tm_vmem = max(128, ((_TILE_BUDGET_BYTES - w_bytes) // per_row) // 128 * 128)
    tm = min(4096, tm_vmem)                 # big tiles: ~1-4 MiB of A per grid step
    n_tiles = _cdiv(P, tm)
    if n_tiles == 1 and P >= 256:
        n_tiles = 2                         # >= 2 row tiles so the "parallel" M axis
                                            # shards across both v7x TensorCores
    tm = max(128, _round_up(_cdiv(P, n_tiles), 128))
    return tm, n_tiles * tm


# ----------------------------- Pallas kernels ------------------------------- #

def _proj_kernel_resident(a_ref, w_ref, o_ref):
    """Weight-resident path: one MXU dot per row tile, no accumulator round trip."""
    o_ref[...] = jnp.dot(a_ref[...], w_ref[...],
                         preferred_element_type=jnp.float32).astype(o_ref.dtype)


def _proj_kernel_tiled(a_ref, w_ref, o_ref, acc_ref):
    """Fallback path: (TM, TN) output tile accumulated over the K grid axis."""
    @pl.when(pl.program_id(2) == 0)
    def _init():
        acc_ref[...] = jnp.zeros_like(acc_ref)

    acc_ref[...] += jnp.dot(a_ref[...], w_ref[...],
                            preferred_element_type=jnp.float32)

    @pl.when(pl.program_id(2) == pl.num_programs(2) - 1)
    def _store():
        o_ref[...] = acc_ref[...].astype(o_ref.dtype)


def _patch_projection(patches, w_km):
    """patches (P, K) bf16 @ w_km (K, OC) bf16 -> (P, OC) f32 via a Pallas GEMM."""
    P, K = patches.shape
    K2, OC = w_km.shape
    assert K == K2

    K_pad = _round_up(K, 128)
    OC_pad = _round_up(OC, 128)
    w_resident_bytes = 2 * K_pad * OC_pad * 2     # double-buffered bf16 weight

    if w_resident_bytes <= _RESIDENT_W_BYTES:
        # ---------------- weight-resident path (common case) ----------------
        TM, P_pad = _row_tile(P, K_pad, OC_pad, w_resident_bytes)

        if (P_pad, K_pad) != (P, K):
            patches = jnp.pad(patches, ((0, P_pad - P), (0, K_pad - K)))
        if (K_pad, OC_pad) != (K, OC):
            w_km = jnp.pad(w_km, ((0, K_pad - K), (0, OC_pad - OC)))

        out = pl.pallas_call(
            _proj_kernel_resident,
            out_shape=jax.ShapeDtypeStruct((P_pad, OC_pad), jnp.float32),
            grid_spec=pltpu.PrefetchScalarGridSpec(
                num_scalar_prefetch=0,
                grid=(P_pad // TM,),
                in_specs=[
                    pl.BlockSpec((TM, K_pad), lambda i: (i, 0)),
                    # Constant block index -> the weight is DMA'd exactly once
                    # and stays resident in VMEM for every row tile (no
                    # per-M-tile re-streaming of the weight).
                    pl.BlockSpec((K_pad, OC_pad), lambda i: (0, 0)),
                ],
                out_specs=pl.BlockSpec((TM, OC_pad), lambda i: (i, 0)),
            ),
            compiler_params=pltpu.CompilerParams(
                dimension_semantics=("parallel",),
                vmem_limit_bytes=_VMEM_LIMIT_BYTES,
                # Let XLA fuse the patch-extraction producer (cast+pad+
                # transpose/reshape) into the activation input stream so
                # `patches` need not be materialized separately in HBM.
                allow_input_fusion=[True, False],
            ),
        )(patches, w_km)
        return out[:P, :OC]

    # -------- fallback: weight too large to keep resident in VMEM -----------
    TM, P_pad = _tile_and_pad(P, 512)
    TN, N_pad = _tile_and_pad(OC, 512)
    TK, Kt_pad = _tile_and_pad(K, 2048)

    if (P_pad, Kt_pad) != (P, K):
        patches = jnp.pad(patches, ((0, P_pad - P), (0, Kt_pad - K)))
    if (Kt_pad, N_pad) != (K, OC):
        w_km = jnp.pad(w_km, ((0, Kt_pad - K), (0, N_pad - OC)))

    out = pl.pallas_call(
        _proj_kernel_tiled,
        out_shape=jax.ShapeDtypeStruct((P_pad, N_pad), jnp.float32),
        grid_spec=pltpu.PrefetchScalarGridSpec(
            num_scalar_prefetch=0,
            grid=(P_pad // TM, N_pad // TN, Kt_pad // TK),
            in_specs=[
                pl.BlockSpec((TM, TK), lambda i, j, k: (i, k)),
                pl.BlockSpec((TK, TN), lambda i, j, k: (k, j)),
            ],
            out_specs=pl.BlockSpec((TM, TN), lambda i, j, k: (i, j)),
            scratch_shapes=[pltpu.VMEM((TM, TN), jnp.float32)],
        ),
        compiler_params=pltpu.CompilerParams(
            dimension_semantics=("parallel", "parallel", "arbitrary"),
            vmem_limit_bytes=_VMEM_LIMIT_BYTES,
        ),
    )(patches, w_km)
    return out[:P, :OC]


# --------------------------- ImageToPatch4D glue ---------------------------- #

def _pad_amounts(size, patch):
    """Symmetric-ish pad amounts exactly as in the PyTorch module."""
    mod = size % patch
    if mod:
        pad = patch - mod
        front = pad // 2
        return front, pad - front
    return 0, 0


class ImageToPatch4D:
    """JAX/Pallas port of canglong.embed.ImageToPatch4D (normalization_layer=None)."""

    def __init__(self, img_dims, patch_dims, in_channels, out_channels, key):
        self.img_dims = img_dims
        self.patch_dims = patch_dims
        self.in_channels = in_channels
        self.out_channels = out_channels

        # NOTE: faithful to the PyTorch module, which unpacks img_dims as
        # (time, depth, height, width) in __init__ even though its forward()
        # asserts img_dims == (C, T, H, W).  Pad amounts therefore reproduce the
        # original module's behaviour exactly (quirk and all).
        time, depth, height, width = img_dims
        pt, pd, ph, pw = patch_dims
        self.pad_t = _pad_amounts(time, pt)
        self.pad_d = _pad_amounts(depth, pd)
        self.pad_h = _pad_amounts(height, ph)
        self.pad_w = _pad_amounts(width, pw)

        # Conv4d weight (out_channels, in_channels, pt, pd, ph, pw), bias=False.
        # kaiming_uniform_(a=sqrt(5)) == uniform(-1/sqrt(fan_in), 1/sqrt(fan_in)).
        fan_in = in_channels * pt * pd * ph * pw
        bound = 1.0 / math.sqrt(fan_in)
        self.weight = jax.random.uniform(
            key, (out_channels, in_channels, pt, pd, ph, pw),
            dtype=jnp.float32, minval=-bound, maxval=bound,
        )

    def __call__(self, x):
        # x: (B, C, T, D, H, W) float32, channel-first (PyTorch NCDHW-family).
        B, C, T, D, H, W = x.shape
        pt, pd, ph, pw = self.patch_dims
        K = C * pt * pd * ph * pw

        # bf16 operands (native MXU dtype, half the HBM bytes); accumulation is
        # f32 inside the kernel.  Documented deviation from the f32 PyTorch conv.
        x = x.astype(jnp.bfloat16)

        # ConstantPad over (T, D, H, W) with the same amounts as the PyTorch module.
        x = jnp.pad(x, ((0, 0), (0, 0),
                        self.pad_t, self.pad_d, self.pad_h, self.pad_w))
        _, _, Tp, Dp, Hp, Wp = x.shape
        To, Do, Ho, Wo = Tp // pt, Dp // pd, Hp // ph, Wp // pw

        # im2col for stride == kernel: (B,C,To,pt,Do,pd,Ho,ph,Wo,pw)
        #   -> (B,To,Do,Ho,Wo,C,pt,pd,ph,pw) -> (P, K).
        # With allow_input_fusion this producer can be folded into the kernel's
        # A-input stream instead of being materialized separately in HBM.
        xp = x.reshape(B, C, To, pt, Do, pd, Ho, ph, Wo, pw)
        xp = xp.transpose(0, 2, 4, 6, 8, 1, 3, 5, 7, 9)
        patches = xp.reshape(B * To * Do * Ho * Wo, K)

        # weight (OC, C, pt, pd, ph, pw) -> (K, OC); bf16 operand, f32 accumulate.
        w_km = self.weight.reshape(self.out_channels, K).T.astype(jnp.bfloat16)

        out = _patch_projection(patches, w_km)                    # (P, OC) f32
        out = out.reshape(B, To, Do, Ho, Wo, self.out_channels)
        out = out.transpose(0, 5, 1, 2, 3, 4)                     # (B, OC, To, Do, Ho, Wo)
        # TODO(synk): normalization_layer path (LayerNorm over channels) not wired; module default is None.
        return out


# --------------------------- reference + driver ----------------------------- #

def _reference(module, x):
    """Pure-JAX reference (same bf16 operand cast, f32 accumulation)."""
    B, C, T, D, H, W = x.shape
    pt, pd, ph, pw = module.patch_dims
    x = jnp.pad(x.astype(jnp.bfloat16),
                ((0, 0), (0, 0),
                 module.pad_t, module.pad_d, module.pad_h, module.pad_w))
    _, _, Tp, Dp, Hp, Wp = x.shape
    To, Do, Ho, Wo = Tp // pt, Dp // pd, Hp // ph, Wp // pw
    xp = x.reshape(B, C, To, pt, Do, pd, Ho, ph, Wo, pw)
    xp = xp.transpose(0, 2, 4, 6, 8, 1, 3, 5, 7, 9).reshape(B, To, Do, Ho, Wo, -1)
    w = module.weight.reshape(module.out_channels, -1).astype(jnp.bfloat16)
    return jnp.einsum("btdhwk,ok->botdhw", xp, w,
                      preferred_element_type=jnp.float32)


if __name__ == "__main__":
    key = jax.random.PRNGKey(0)
    k_x, k_w = jax.random.split(key)

    # Small shapes consistent with the module's forward assert:
    #   C == img_dims[0], T == img_dims[1], H == img_dims[2], W == img_dims[3]
    B, C, T, D, H, W = 2, 4, 4, 4, 8, 8
    img_dims = (C, T, H, W)
    patch_dims = (2, 2, 4, 4)
    in_channels, out_channels = C, 32

    x = jax.random.normal(k_x, (B, C, T, D, H, W), dtype=jnp.float32)
    module = ImageToPatch4D(img_dims, patch_dims, in_channels, out_channels, k_w)

    out = jax.block_until_ready(module(x))
    ref = jax.block_until_ready(_reference(module, x))

    assert out.shape == (B, out_channels, T // patch_dims[0], D // patch_dims[1],
                         H // patch_dims[2], W // patch_dims[3]), out.shape
    assert jnp.allclose(out, ref, atol=1e-3, rtol=1e-3), \
        float(jnp.max(jnp.abs(out - ref)))

    print("KERNEL_OK")
</pallas_src>

<mosaic_0001>
module attributes {stable_mosaic.version = 11 : i64} {
  func.func @_proj_kernel_resident(%arg0: i32, %arg1: memref<128x256xbf16, #tpu.memory_space<vmem>>, %arg2: memref<256x128xbf16, #tpu.memory_space<vmem>>, %arg3: memref<128x128xf32, #tpu.memory_space<vmem>>) attributes {dimension_semantics = [#tpu.dimension_semantics<parallel>], iteration_bounds = array<i64: 1>, scalar_prefetch = 0 : i64, scratch_operands = 0 : i64, tpu.core_type = #tpu.core_type<tc>, window_params = [{transform_indices = @transform_0, window_bounds = array<i64: 128, 256>}, {pipeline_mode = #tpu.pipeline_mode<synchronous>, transform_indices = @transform_1, window_bounds = array<i64: 256, 128>}, {transform_indices = @transform_2, window_bounds = array<i64: 128, 128>}]} {
    %c0 = arith.constant 0 : index
    %c0_0 = arith.constant 0 : index
    %0 = vector.load %arg1[%c0, %c0_0] : memref<128x256xbf16, #tpu.memory_space<vmem>>, vector<128x256xbf16>
    %c0_1 = arith.constant 0 : index
    %c0_2 = arith.constant 0 : index
    %1 = vector.load %arg2[%c0_1, %c0_2] : memref<256x128xbf16, #tpu.memory_space<vmem>>, vector<256x128xbf16>
    %cst = arith.constant dense<0.000000e+00> : vector<128x128xf32>
    %2 = tpu.matmul %0, %1, %cst {dimension_numbers = #tpu.dot_dimension_numbers<[1], [0], [0], [1], [0, 0, 1, 1], [], []>} : vector<128x256xbf16>, vector<256x128xbf16>, vector<128x128xf32> -> vector<128x128xf32>
    %c0_3 = arith.constant 0 : index
    %c0_4 = arith.constant 0 : index
    %3 = vector.load %arg3[%c0_3, %c0_4] : memref<128x128xf32, #tpu.memory_space<vmem>>, vector<128x128xf32>
    tpu.vector_store %arg3[%c0_3, %c0_4], %2 {strides = array<i32>} : memref<128x128xf32, #tpu.memory_space<vmem>>, vector<128x128xf32>,
    return
  }
  func.func @transform_0(%arg0: i32) -> (i32, i32) {
    %c0_i32 = arith.constant 0 : i32
    %c0_i32_0 = arith.constant 0 : i32
    return %arg0, %c0_i32 : i32, i32
  }
  func.func @transform_1(%arg0: i32) -> (i32, i32) {
    %c0_i32 = arith.constant 0 : i32
    %c0_i32_0 = arith.constant 0 : i32
    %c0_i32_1 = arith.constant 0 : i32
    return %c0_i32, %c0_i32_0 : i32, i32
  }
  func.func @transform_2(%arg0: i32) -> (i32, i32) {
    %c0_i32 = arith.constant 0 : i32
    %c0_i32_0 = arith.constant 0 : i32
    return %arg0, %c0_i32 : i32, i32
  }
}

</mosaic_0001>

<bundles_post_ra>
// kernel: tpu_custom_call.1
= control target key start
LH: loop header
LB: loop body
LE: loop exit
PB: predicated region body
PF: predicated region fallthrough
CT: control target
= control target key end

     0   :  { %7 = vsyncpa [#allocation3], 0  ;;  %s658_s0 = inlined_call_operand.hbm [shape: bf16[128,256], index: 0, kind: input, shape index: {}]   ;;  %s659_s1 = inlined_call_operand.hbm [shape: bf16[256,128], index: 1, kind: input, shape index: {}]   ;;  %s660_s2 = inlined_call_operand.hbm [shape: f32[128,128], index: 2, kind: output, shape index: {}]  }
   0x1   :  { %8 = vsyncpa [#allocation6], 0 }
   0x2   :  { %9 = vsyncpa [#allocation4], 0  ;;  %s621_s9 = smov [#allocation2]  }
   0x3   :  { %s15_s10 = sshll.u32 %s621_s9, 4  ;;  %s16_s10 = int_to_ptr.vmem [resolvable:$true] %s15_s10 }
   0x4   :  { %s563_s11 = scalar_lea.vmem %s16_s10, 2048  ;;  %p568_p1 = scmp.lt.s32.totalorder %s16_s10, %s16_s10 }
   0x5   :  { %p564_p0 = scmp.ne.s32.totalorder %s16_s10, %s563_s11  ;;  %p569_p2 = scmp.lt.s32.totalorder %s563_s11, %s563_s11 }
   0x7   :  { %p570_p3 = por %p569_p2, %p568_p1 }
   0x9   :  { %p571_p4 = pnand %p570_p3, %p564_p0 }
   0xb   :  { %574 = shalt.err (!%p571_p4)
}
   0xc   :  { %s622_s12 = smov 128   ;;  %s623_s13 = smov 8  }
   0xd   :  { %21 = dma.hbm_to_vmem [thread:$0]  %s658_s0, 2048, %s16_s10, [#allocation3], %s622_s12, %s622_s12, %s623_s13  }
   0xe   :  { %s624_s16 = smov [#allocation5]  }
   0xf   :  { %s27_s17 = sshll.u32 %s624_s16, 4  ;;  %s28_s17 = int_to_ptr.vmem [resolvable:$true] %s27_s17 }
  0x10   :  { %s583_s18 = scalar_lea.vmem %s28_s17, 2048  ;;  %p588_p6 = scmp.lt.s32.totalorder %s28_s17, %s28_s17 }
  0x11   :  { %p584_p5 = scmp.ne.s32.totalorder %s28_s17, %s583_s18  ;;  %p589_p7 = scmp.lt.s32.totalorder %s583_s18, %s583_s18 }
  0x13   :  { %p590_p8 = por %p589_p7, %p588_p6 }
  0x15   :  { %p591_p9 = pnand %p590_p8, %p584_p5 }
  0x17   :  { %594 = shalt.err (!%p591_p9)
}
  0x18   :  { %s625_s19 = smov 64   ;;  %s626_s20 = smov 4  }
  0x19   :  { %33 = dma.hbm_to_vmem [thread:$0]  %s659_s1, 2048, %s28_s17, [#allocation6], %s625_s19, %s625_s19, %s626_s20  }
  0x1a   :  { %615 = dma.done.wait [#allocation3], 2048  }
  0x1b   :  { %616 = vsyncadd [#allocation3], 4294965248 }
  0x1c   :  { %617 = dma.done.wait [#allocation6], 2048  }
  0x1d   :  { %618 = vsyncadd [#allocation6], 4294965248  ;;  %v515_v0 = vld [vmem:[#allocation5 + $0x78] sm:$0xff]   ;;  %v517_v2 = vld [vmem:[#allocation5 + $0x70] sm:$0xff]   ;;  %s627_s0 = smov [#allocation7]  }
  0x1e   :  { %v516_v1 = vld [vmem:[#allocation5 + $0x38] sm:$0xff]   ;;  %428 = vmatprep.subr.bf16.mxu0 %v515_v0  ;;  %492 = vmatprep.subr.bf16.mxu1 %v515_v0  ;;  %v518_v3 = vld [vmem:[#allocation5 + $0x30] sm:$0xff]   ;;  %v519_v4 = vld [vmem:[#allocation5 + $0x68] sm:$0xff]   ;;  %s383_s1 = sshll.u32 %s627_s0, 4  ;;  %s384_s1 = int_to_ptr.vmem [resolvable:$true] %s383_s1 }
  0x1f   :  { %429 = vmatpush3.bf16.msra.mxu0 %v516_v1  ;;  %500 = vmatpush3.bf16.msra.mxu1 %v516_v1  ;;  %v520_v5 = vld [vmem:[#allocation5 + $0x28] sm:$0xff]   ;;  %v521_v6 = vld [vmem:[#allocation5 + $0x60] sm:$0xff]   ;;  %v523_v8 = vld [vmem:[#allocation5 + $0x58] sm:$0xff]   ;;  %s595_s23 = scalar_lea.vmem %s384_s1, 2048  ;;  %p600_p11 = scmp.lt.s32.totalorder %s384_s1, %s384_s1 }
  0x20   :  { %430 = vmatprep.subr.bf16.mxu0 %v517_v2  ;;  %493 = vmatprep.subr.bf16.mxu1 %v517_v2  ;;  %v522_v7 = vld [vmem:[#allocation5 + $0x20] sm:$0xff]   ;;  %v524_v9 = vld [vmem:[#allocation5 + $0x18] sm:$0xff]   ;;  %v525_v10 = vld [vmem:[#allocation5 + $0x50] sm:$0xff]   ;;  %p596_p10 = scmp.ne.s32.totalorder %s384_s1, %s595_s23  ;;  %p601_p12 = scmp.lt.s32.totalorder %s595_s23, %s595_s23 }
  0x21   :  { %v533_v11 = vld [vmem:[#allocation2 + $0x4] ss:$8 sps:$4 sm:$0xff]   ;;  %v526_v13 = vld [vmem:[#allocation5 + $0x10] sm:$0xff]   ;;  %v531_v18 = vld [vmem:[#allocation2] ss:$8 sps:$4 sm:$0xff]  }
  0x22   :  { %v536_v12 = vld [vmem:[#allocation2 + $0x44] ss:$8 sps:$4 sm:$0xff]   ;;  %297 = vmatprep.mubr.bf16.mxu0 %v533_v11  ;;  %v534_v19 = vld [vmem:[#allocation2 + $0x40] ss:$8 sps:$4 sm:$0xff]   ;;  %v537_v20 = vld [vmem:[#allocation2 + $0x14] ss:$8 sps:$4 sm:$0xff]   ;;  %p602_p13 = por %p601_p12, %p600_p11 }
  0x23   :  { %431 = vmatpush3.bf16.msra.mxu0 %v518_v3  ;;  %501 = vmatpush3.bf16.msra.mxu1 %v518_v3  ;;  %v527_v14 = vld [vmem:[#allocation5 + $0x48] sm:$0xff]   ;;  %v529_v16 = vld [vmem:[#allocation5 + $0x40] sm:$0xff]   ;;  %v539_v21 = vld [vmem:[#allocation2 + $0x54] ss:$8 sps:$4 sm:$0xff]  }
  0x24   :  { %432 = vmatprep.subr.bf16.mxu0 %v519_v4  ;;  %494 = vmatprep.subr.bf16.mxu1 %v519_v4  ;;  %v528_v15 = vld [vmem:[#allocation5 + $0x8] sm:$0xff]   ;;  %v530_v17 = vld [vmem:[#allocation5] sm:$0xff]   ;;  %v541_v22 = vld [vmem:[#allocation2 + $0x10] ss:$8 sps:$4 sm:$0xff]   ;;  %p603_p0 = pnand %p602_p13, %p596_p10 }
  0x25   :  { %329 = vmatprep.mubr.bf16.mxu1 %v536_v12  ;;  %v542_v23 = vld [vmem:[#allocation2 + $0x50] ss:$8 sps:$4 sm:$0xff]   ;;  %v543_v24 = vld [vmem:[#allocation2 + $0x24] ss:$8 sps:$4 sm:$0xff]   ;;  %v547_v26 = vld [vmem:[#allocation2 + $0x20] ss:$8 sps:$4 sm:$0xff]  }
  0x26   :  { %v545_v25 = vld [vmem:[#allocation2 + $0x64] ss:$8 sps:$4 sm:$0xff]   ;;  %v548_v27 = vld [vmem:[#allocation2 + $0x60] ss:$8 sps:$4 sm:$0xff]   ;;  %v549_v28 = vld [vmem:[#allocation2 + $0x34] ss:$8 sps:$4 sm:$0xff]  }
  0x27   :  { %433 = vmatpush3.bf16.msra.mxu0 %v520_v5  ;;  %502 = vmatpush3.bf16.msra.mxu1 %v520_v5  ;;  %v551_v29 = vld [vmem:[#allocation2 + $0x74] ss:$8 sps:$4 sm:$0xff]   ;;  %v553_v30 = vld [vmem:[#allocation2 + $0x30] ss:$8 sps:$4 sm:$0xff]  }
  0x28   :  { %434 = vmatprep.subr.bf16.mxu0 %v521_v6  ;;  %495 = vmatprep.subr.bf16.mxu1 %v521_v6  ;;  %v554_v31 = vld [vmem:[#allocation2 + $0x70] ss:$8 sps:$4 sm:$0xff]  }
  0x2b   :  { %435 = vmatpush3.bf16.msra.mxu0 %v522_v7  ;;  %503 = vmatpush3.bf16.msra.mxu1 %v522_v7 }
  0x2c   :  { %436 = vmatprep.subr.bf16.mxu0 %v523_v8  ;;  %496 = vmatprep.subr.bf16.mxu1 %v523_v8 }
  0x2f   :  { %437 = vmatpush3.bf16.msra.mxu0 %v524_v9  ;;  %504 = vmatpush3.bf16.msra.mxu1 %v524_v9 }
  0x30   :  { %438 = vmatprep.subr.bf16.mxu0 %v525_v10  ;;  %497 = vmatprep.subr.bf16.mxu1 %v525_v10 }
  0x33   :  { %439 = vmatpush3.bf16.msra.mxu0 %v526_v13  ;;  %505 = vmatpush3.bf16.msra.mxu1 %v526_v13 }
  0x34   :  { %440 = vmatprep.subr.bf16.mxu0 %v527_v14  ;;  %498 = vmatprep.subr.bf16.mxu1 %v527_v14 }
  0x37   :  { %441 = vmatpush3.bf16.msra.mxu0 %v528_v15  ;;  %506 = vmatpush3.bf16.msra.mxu1 %v528_v15 }
  0x38   :  { %442 = vmatprep.subr.bf16.mxu0 %v529_v16  ;;  %499 = vmatprep.subr.bf16.mxu1 %v529_v16 }
  0x3b   :  { %443 = vmatpush3.bf16.msra.mxu0 %v530_v17  ;;  %507 = vmatpush3.bf16.msra.mxu1 %v530_v17 }
  0x3e   :  { %298 = vmatmul.mubr.bf16.vlgmr.msra.gmra.mxu0 %v531_v18  ;;  %330 = vmatmul.mubr.bf16.vlgmr.msra.gmra.mxu1 %v534_v19 }
  0x3f   :  { %305 = vmatprep.mubr.bf16.mxu0 %v537_v20  ;;  %337 = vmatprep.mubr.bf16.mxu1 %v539_v21 }
  0x46   :  { %306 = vmatmul.mubr.bf16.gmra.mxu0 %v541_v22  ;;  %338 = vmatmul.mubr.bf16.gmra.mxu1 %v542_v23 }
  0x47   :  { %313 = vmatprep.mubr.bf16.mxu0 %v543_v24  ;;  %345 = vmatprep.mubr.bf16.mxu1 %v545_v25 }
  0x4e   :  { %314 = vmatmul.mubr.bf16.gmra.mxu0 %v547_v26  ;;  %346 = vmatmul.mubr.bf16.gmra.mxu1 %v548_v27 }
  0x4f   :  { %321 = vmatprep.mubr.bf16.mxu0 %v549_v28  ;;  %353 = vmatprep.mubr.bf16.mxu1 %v551_v29 }
  0x56   :  { %322 = vmatmul.mubr.bf16.gmra.mxu0 %v553_v30  ;;  %354 = vmatmul.mubr.bf16.gmra.mxu1 %v554_v31 }
  0xfe   :  { %v444_v32 = vpop.f32.mrf.mxu0  ;;  %v468_v33 = vpop.f32.mrf.mxu1 }
 0x100   :  { %v445_v34 = vpop.f32.mrf.mxu0  ;;  %v469_v35 = vpop.f32.mrf.mxu1 }
 0x101   :  { %v446_v36 = vadd.f32 %v445_v34, %v444_v32  ;;  %v470_v37 = vadd.f32 %v469_v35, %v468_v33 }
 0x102   :  { %v447_v38 = vpop.f32.mrf.mxu0  ;;  %v471_v39 = vpop.f32.mrf.mxu1 }
 0x103   :  { %362 = vst [vmem:[#allocation7] sm:$0xff] %v446_v36  ;;  %370 = vst [vmem:[#allocation7 + $0x40] sm:$0xff] %v470_v37 }
 0x104   :  { %v448_v40 = vpop.f32.mrf.mxu0  ;;  %v472_v41 = vpop.f32.mrf.mxu1 }
 0x105   :  { %v449_v42 = vadd.f32 %v448_v40, %v447_v38  ;;  %v473_v43 = vadd.f32 %v472_v41, %v471_v39 }
 0x106   :  { %v450_v44 = vpop.f32.mrf.mxu0  ;;  %v474_v45 = vpop.f32.mrf.mxu1 }
 0x107   :  { %363 = vst [vmem:[#allocation7 + $0x8] sm:$0xff] %v449_v42  ;;  %371 = vst [vmem:[#allocation7 + $0x48] sm:$0xff] %v473_v43 }
 0x108   :  { %v451_v46 = vpop.f32.mrf.mxu0  ;;  %v475_v47 = vpop.f32.mrf.mxu1 }
 0x109   :  { %v452_v48 = vadd.f32 %v451_v46, %v450_v44  ;;  %v476_v49 = vadd.f32 %v475_v47, %v474_v45 }
 0x10a   :  { %v453_v50 = vpop.f32.mrf.mxu0  ;;  %v477_v51 = vpop.f32.mrf.mxu1 }
 0x10b   :  { %364 = vst [vmem:[#allocation7 + $0x10] sm:$0xff] %v452_v48  ;;  %372 = vst [vmem:[#allocation7 + $0x50] sm:$0xff] %v476_v49 }
 0x10c   :  { %v454_v52 = vpop.f32.mrf.mxu0  ;;  %v478_v53 = vpop.f32.mrf.mxu1 }
 0x10d   :  { %v455_v54 = vadd.f32 %v454_v52, %v453_v50  ;;  %v479_v55 = vadd.f32 %v478_v53, %v477_v51 }
 0x10e   :  { %v456_v56 = vpop.f32.mrf.mxu0  ;;  %v480_v57 = vpop.f32.mrf.mxu1 }
 0x10f   :  { %365 = vst [vmem:[#allocation7 + $0x18] sm:$0xff] %v455_v54  ;;  %373 = vst [vmem:[#allocation7 + $0x58] sm:$0xff] %v479_v55 }
 0x110   :  { %v457_v58 = vpop.f32.mrf.mxu0  ;;  %v481_v59 = vpop.f32.mrf.mxu1 }
 0x111   :  { %v458_v60 = vadd.f32 %v457_v58, %v456_v56  ;;  %v482_v61 = vadd.f32 %v481_v59, %v480_v57 }
 0x112   :  { %v459_v62 = vpop.f32.mrf.mxu0  ;;  %v483_v63 = vpop.f32.mrf.mxu1 }
 0x113   :  { %366 = vst [vmem:[#allocation7 + $0x20] sm:$0xff] %v458_v60  ;;  %374 = vst [vmem:[#allocation7 + $0x60] sm:$0xff] %v482_v61 }
 0x114   :  { %v460_v0 = vpop.f32.mrf.mxu0  ;;  %v484_v1 = vpop.f32.mrf.mxu1 }
 0x115   :  { %v461_v2 = vadd.f32 %v460_v0, %v459_v62  ;;  %v485_v3 = vadd.f32 %v484_v1, %v483_v63 }
 0x116   :  { %v462_v4 = vpop.f32.mrf.mxu0  ;;  %v486_v5 = vpop.f32.mrf.mxu1 }
 0x117   :  { %367 = vst [vmem:[#allocation7 + $0x28] sm:$0xff] %v461_v2  ;;  %375 = vst [vmem:[#allocation7 + $0x68] sm:$0xff] %v485_v3 }
 0x118   :  { %v463_v6 = vpop.f32.mrf.mxu0  ;;  %v487_v7 = vpop.f32.mrf.mxu1 }
 0x119   :  { %v464_v8 = vadd.f32 %v463_v6, %v462_v4  ;;  %v488_v9 = vadd.f32 %v487_v7, %v486_v5 }
 0x11a   :  { %v465_v10 = vpop.f32.mrf.mxu0  ;;  %v489_v11 = vpop.f32.mrf.mxu1 }
 0x11b   :  { %368 = vst [vmem:[#allocation7 + $0x30] sm:$0xff] %v464_v8  ;;  %376 = vst [vmem:[#allocation7 + $0x70] sm:$0xff] %v488_v9 }
 0x11c   :  { %v466_v12 = vpop.f32.mrf.mxu0  ;;  %v490_v13 = vpop.f32.mrf.mxu1 }
 0x11d   :  { %v467_v14 = vadd.f32 %v466_v12, %v465_v10  ;;  %v491_v15 = vadd.f32 %v490_v13, %v489_v11 }
 0x11f   :  { %369 = vst [vmem:[#allocation7 + $0x38] sm:$0xff] %v467_v14  ;;  %377 = vst [vmem:[#allocation7 + $0x78] sm:$0xff] %v491_v15 }
 0x120   :  { %606 = shalt.err (!%p603_p0)
}
 0x121   :  { %389 = dma.vmem_to_hbm [thread:$0]  %s384_s1, 2048, %s660_s2, [#allocation4], %s622_s12, %s622_s12, %s623_s13  }
 0x122   :  { %619 = dma.done.wait [#allocation4], 2048  }
 0x123   :  { %620 = vsyncadd [#allocation4], 4294965248 }
 0x124   :  { %393 = vsyncpa [#allocation3], 1 }
 0x125   :  { %394 = vsyncpa [#allocation6], 1 }
 0x126   :  { %395 = vsyncpa [#allocation4], 1 }

</bundles_post_ra>
